<compile_context>
chip_gen: v7x
topology: tpu7x:2x2x1
jax: 0.10.0
libtpu: 0.0.40
codegen_flags: <defaults>
</compile_context>

<pallas_src>
import jax
import jax.numpy as jnp
from jax import lax
from jax.experimental import pallas as pl
from jax.experimental.pallas import tpu as pltpu

# ----------------------------- configuration ---------------------------------
B = 2                        # batch
N = 8                        # sequence length
H = 128                      # config.hidden_size (lane-dense output)
VOCAB = 64                   # config.vocab_size (row 0 == padding_idx)

DIAG_RANGE = (10, 30)        # token ids [10, 30) are diagnosis codes
MED_RANGE = (30, 46)         # token ids [30, 46) are medication codes
N_DIAG_CODES = DIAG_RANGE[1] - DIAG_RANGE[0]     # rows of diag_tree_table (20)
N_MED_CODES = MED_RANGE[1] - MED_RANGE[0]        # rows of med_tree_table  (16)
DIAG_DEPTH = 4               # diag_tree_table.shape[1]
MED_DEPTH = 4                # med_tree_table.shape[1]
N_DIAG_TOKENS = 40           # vocabulary of diag ontology-tree nodes
N_MED_TOKENS = 32            # vocabulary of med ontology-tree nodes
D_DIAG = H // DIAG_DEPTH     # per-node embedding dim (32)
D_MED = H // MED_DEPTH       # per-node embedding dim (32)


# ----------------------------- fused Pallas kernel ----------------------------
def _tree_embeddings_kernel(ids_ref, table_ref, out_ref):
    """out[t] = table[ids[t]] via a single one-hot matmul on the MXU."""
    ids = ids_ref[...]                                        # (BN, 1) int32
    bn = ids.shape[0]
    vocab = table_ref.shape[0]
    one_hot = (ids == lax.broadcasted_iota(jnp.int32, (bn, vocab), 1))
    one_hot = one_hot.astype(table_ref.dtype)                 # exact 0/1 in bf16
    out_ref[...] = jnp.dot(one_hot, table_ref[...],
                           preferred_element_type=jnp.float32)


@jax.jit
def tree_embeddings_forward(word_emb, diag_tok, med_tok, diag_tbl, med_tbl,
                            input_ids, token_types):
    """TreeEmbeddings.forward — returns (B, N, H) embeddings."""
    del token_types                                   # unused by the reference forward

    # ---- fold the static ontology tables into ONE combined lookup table -----
    # (plain XLA, outside the kernel; in a real model this is recomputed only
    #  when the embedding weights change)
    diag_tree = diag_tok[diag_tbl].reshape(N_DIAG_CODES, H)   # (20, H)
    med_tree = med_tok[med_tbl].reshape(N_MED_CODES, H)       # (16, H)
    combined = word_emb
    combined = combined.at[DIAG_RANGE[0]:DIAG_RANGE[1]].set(diag_tree)
    combined = combined.at[MED_RANGE[0]:MED_RANGE[1]].set(med_tree)
    combined = combined.astype(jnp.bfloat16)                  # halve table DMA bytes

    ids2d = input_ids.reshape(B * N, 1).astype(jnp.int32)

    cost = pl.CostEstimate(
        flops=2 * B * N * VOCAB * H,
        transcendentals=0,
        bytes_accessed=ids2d.size * 4 + combined.size * 2 + B * N * H * 4,
    )

    out2d = pl.pallas_call(
        _tree_embeddings_kernel,
        out_shape=jax.ShapeDtypeStruct((B * N, H), jnp.float32),
        in_specs=[pl.BlockSpec(memory_space=pltpu.MemorySpace.VMEM)] * 2,
        out_specs=pl.BlockSpec(memory_space=pltpu.MemorySpace.VMEM),
        cost_estimate=cost,
    )(ids2d, combined)
    # TODO(synk): emb_dropout is identity here (eval mode; no RNG threaded).
    return out2d.reshape(B, N, H)


# ----------------------------- pure-JAX reference ------------------------------
def tree_embeddings_ref(word_emb, diag_tok, med_tok, diag_tbl, med_tbl, input_ids):
    b, n = input_ids.shape
    ids = input_ids.reshape(-1)
    diag_tree = diag_tok[diag_tbl].reshape(N_DIAG_CODES, H)
    med_tree = med_tok[med_tbl].reshape(N_MED_CODES, H)
    words = word_emb[ids]
    diag_mask = (ids >= DIAG_RANGE[0]) & (ids < DIAG_RANGE[1])
    med_mask = (ids >= MED_RANGE[0]) & (ids < MED_RANGE[1])
    diag_e = diag_tree[jnp.clip(ids - DIAG_RANGE[0], 0, N_DIAG_CODES - 1)]
    med_e = med_tree[jnp.clip(ids - MED_RANGE[0], 0, N_MED_CODES - 1)]
    out = jnp.where(diag_mask[:, None], diag_e, words)
    out = jnp.where(med_mask[:, None], med_e, out)
    return out.reshape(b, n, H)


# ----------------------------- main --------------------------------------------
if __name__ == "__main__":
    key = jax.random.PRNGKey(0)
    k_word, k_dtok, k_mtok, k_dtbl, k_mtbl, k_ids = jax.random.split(key, 6)

    # learnable tables (nn.Embedding weights)
    word_emb = 0.02 * jax.random.normal(k_word, (VOCAB, H), dtype=jnp.float32)
    word_emb = word_emb.at[0].set(0.0)                       # padding_idx = 0
    diag_tok = 0.02 * jax.random.normal(k_dtok, (N_DIAG_TOKENS, D_DIAG), jnp.float32)
    med_tok = 0.02 * jax.random.normal(k_mtok, (N_MED_TOKENS, D_MED), jnp.float32)

    # static ontology tables: each code -> its DEPTH tree-node ids
    diag_tbl = jax.random.randint(k_dtbl, (N_DIAG_CODES, DIAG_DEPTH), 0,
                                  N_DIAG_TOKENS, jnp.int32)
    med_tbl = jax.random.randint(k_mtbl, (N_MED_CODES, MED_DEPTH), 0,
                                 N_MED_TOKENS, jnp.int32)

    # inputs: mix of ordinary words, diag codes, med codes and padding
    input_ids = jax.random.randint(k_ids, (B, N), 1, VOCAB, jnp.int32)
    input_ids = input_ids.at[:, 1].set(DIAG_RANGE[0] + 2)    # a diagnosis code
    input_ids = input_ids.at[:, 3].set(MED_RANGE[0] + 5)     # a medication code
    input_ids = input_ids.at[:, 7].set(0)                    # padding token
    token_types = jnp.zeros((B, N), jnp.int32)               # unused by forward

    out = tree_embeddings_forward(word_emb, diag_tok, med_tok,
                                  diag_tbl, med_tbl, input_ids, token_types)
    out = jax.block_until_ready(out)

    ref = tree_embeddings_ref(word_emb, diag_tok, med_tok, diag_tbl, med_tbl, input_ids)
    assert out.shape == (B, N, H)
    assert jnp.allclose(out, ref, atol=1e-3, rtol=1e-3), \
        float(jnp.max(jnp.abs(out - ref)))
    print("KERNEL_OK")
</pallas_src>

<mosaic_0001>
module attributes {stable_mosaic.version = 11 : i64} {
  func.func @_tree_embeddings_kernel(%arg0: memref<16x1xi32, #tpu.memory_space<vmem>>, %arg1: memref<64x128xbf16, #tpu.memory_space<vmem>>, %arg2: memref<16x128xf32, #tpu.memory_space<vmem>>) attributes {dimension_semantics = [], scalar_prefetch = 0 : i64, scratch_operands = 0 : i64, tpu.core_type = #tpu.core_type<tc>} {
    %c0 = arith.constant 0 : index
    %c0_0 = arith.constant 0 : index
    %0 = vector.load %arg0[%c0, %c0_0] : memref<16x1xi32, #tpu.memory_space<vmem>>, vector<16x1xi32>
    %1 = tpu.iota {dimensions = array<i32: 1>} : vector<16x64xi32>
    %2 = vector.broadcast %0 : vector<16x1xi32> to vector<16x64xi32>
    %3 = arith.cmpi eq, %2, %1 : vector<16x64xi32>
    %4 = arith.extui %3 : vector<16x64xi1> to vector<16x64xi32>
    %5 = arith.sitofp %4 : vector<16x64xi32> to vector<16x64xf32>
    %6 = arith.truncf %5 : vector<16x64xf32> to vector<16x64xbf16>
    %c0_1 = arith.constant 0 : index
    %c0_2 = arith.constant 0 : index
    %7 = vector.load %arg1[%c0_1, %c0_2] : memref<64x128xbf16, #tpu.memory_space<vmem>>, vector<64x128xbf16>
    %cst = arith.constant dense<0.000000e+00> : vector<16x128xf32>
    %8 = tpu.matmul %6, %7, %cst {dimension_numbers = #tpu.dot_dimension_numbers<[1], [0], [0], [1], [0, 0, 1, 1], [], []>} : vector<16x64xbf16>, vector<64x128xbf16>, vector<16x128xf32> -> vector<16x128xf32>
    %c0_3 = arith.constant 0 : index
    %c0_4 = arith.constant 0 : index
    %9 = vector.load %arg2[%c0_3, %c0_4] : memref<16x128xf32, #tpu.memory_space<vmem>>, vector<16x128xf32>
    tpu.vector_store %arg2[%c0_3, %c0_4], %8 {strides = array<i32>} : memref<16x128xf32, #tpu.memory_space<vmem>>, vector<16x128xf32>,
    return
  }
}

</mosaic_0001>

<bundles_post_ra>
// kernel: tree_embeddings_forward.1
= control target key start
LH: loop header
LB: loop body
LE: loop exit
PB: predicated region body
PF: predicated region fallthrough
CT: control target
= control target key end

     0   :  { %v184_v1 = vmov 0   ;;  %v185_v2 = vmov 0.0   ;;  %s235_s0 = inlined_call_operand.vmem [shape: s32[16,1], index: 0, kind: input, shape index: {}]   ;;  %s236_s1 = inlined_call_operand.vmem [shape: bf16[64,128], index: 1, kind: input, shape index: {}]   ;;  %s237_s2 = inlined_call_operand.hbm [shape: f32[16,128], index: 2, kind: output, shape index: {}]  }
   0x1   :  { %v13_v0 = vld [vmem:[%s235_s0] sm:$0xff]  ;;  %155 = vset.pattern.permute.xlu0 %v184_v1  ;;  %137 = vmatprep.subr.bf16.mxu0 %v185_v2  ;;  %v14_v4 = vld [vmem:[%s235_s0 + $0x8] sm:$0xff] }
   0x2   :  { %v156_v3 = vld [vmem:[%s236_s1] sm:$0xff]   ;;  %18 = vperm.xlu0 %155, %v13_v0   ;;  %v157_v5 = vld [vmem:[%s236_s1 + $0x8] sm:$0xff]  }
   0x3   :  { %138 = vmatpush3.bf16.msra.mxu0 %v156_v3 }
   0x4   :  { %139 = vmatprep.subr.bf16.mxu0 %v185_v2 }
   0x5   :  { %7 = vsyncpa [#allocation3], 0  ;;  %v158_v6 = vld [vmem:[%s236_s1 + $0x10] sm:$0xff]   ;;  %vm186_vm0 = vmmov 0   ;;  %v159_v7 = vld [vmem:[%s236_s1 + $0x18] sm:$0xff]   ;;  %v15_v8 = vlaneseq  ;;  %vm62_vm3 = vcmask 523264  }
   0x6   :  { %21 = vperm.xlu0 %155, %v14_v4   ;;  %145 = vmatprep.mubr.msk.bf16.mxu0 %vm186_vm0, %v185_v2  ;;  %s187_s0 = smov [#allocation2]  }
   0x7   :  { %140 = vmatpush3.bf16.msra.mxu0 %v157_v5  ;;  %v16_v9 = vand.u32 127, %v15_v8  ;;  %s114_s21 = sshll.u32 %s187_s0, 4  ;;  %s115_s21 = int_to_ptr.vmem [resolvable:$true] %s114_s21 }
   0x8   :  { %141 = vmatprep.subr.bf16.mxu0 %v185_v2  ;;  %s160_s1 = scalar_lea.vmem %s115_s21, 256  ;;  %p165_p1 = scmp.lt.s32.totalorder %s115_s21, %s115_s21 }
   0x9   :  { %p161_p0 = scmp.ne.s32.totalorder %s115_s21, %s160_s1  ;;  %p166_p2 = scmp.lt.s32.totalorder %s160_s1, %s160_s1 }
   0xb   :  { %142 = vmatpush3.bf16.msra.mxu0 %v158_v6  ;;  %p167_p3 = por %p166_p2, %p165_p1 }
   0xc   :  { %143 = vmatprep.subr.bf16.mxu0 %v185_v2 }
   0xd   :  { %p168_p4 = pnand %p167_p3, %p161_p0 }
   0xf   :  { %144 = vmatpush3.bf16.msra.mxu0 %v159_v7 }
  0x81   :  { %v19_v10 = vpop.permute.xlu0 %18 }
  0x82   :  { %vm23_vm1 = vcmp.eq.s32.totalorder %v19_v10, %v16_v9 }
  0x83   :  { %v125_v12 = vsel %vm23_vm1, 1.0, %v185_v2 }
  0x85   :  { %v22_v11 = vpop.permute.xlu0 %21 }
  0x86   :  { %vm24_vm2 = vcmp.eq.s32.totalorder %v22_v11, %v16_v9 }
  0x87   :  { %v126_v13 = vsel %vm24_vm2, 1.0, %v185_v2 }
  0x88   :  { %v29_v14 = vpack.c.bf16 %v126_v13, %v125_v12 }
  0x8a   :  { %146 = vmatmul.mubr.msk.bf16.vlgmr.msra.gmra.mrb[0].mxu0 %vm62_vm3, %v29_v14 }
 0x15d   :  { %v100_v15 = vpop.f32.mrb[0].mxu0 }
 0x15e   :  { %107 = vst [vmem:[#allocation2] sm:$0xff] %v100_v15  ;;  %v147_v16 = vpop.f32.mrb[1].mxu0 }
 0x15f   :  { %v103_v17 = vpop.f32.mrb[2].mxu0 }
 0x160   :  { %108 = vst [vmem:[#allocation2 + $0x8] sm:$0xff] %v103_v17  ;;  %v148_v18 = vpop.f32.mrb[3].mxu0 }
 0x161   :  { %171 = shalt.err (!%p168_p4)
}
 0x162   :  { %s172_s24 = scalar_lea.hbm %s237_s2, 256 }
 0x163   :  { %p173_p5 = scmp.ne.s32.totalorder %s237_s2, %s172_s24  ;;  %p176_p6 = scmp.lt.u32.totalorder %s172_s24, %s237_s2 }
 0x165   :  { %p178_p7 = pnand %p176_p6, %p173_p5 }
 0x167   :  { %181 = shalt.err (!%p178_p7)
}
 0x168   :  { %s188_s29 = smov 128   ;;  %s189_s30 = smov 8  }
 0x169   :  { %120 = dma.vmem_to_hbm [thread:$0]  %s115_s21, 256, %s237_s2, [#allocation3], %s188_s29, %s188_s29, %s189_s30  }
 0x16a   :  { %182 = dma.done.wait [#allocation3], 256  }
 0x16b   :  { %183 = vsyncadd [#allocation3], 4294967040 }
 0x16c   :  { %124 = vsyncpa [#allocation3], 1 }

</bundles_post_ra>
